<compile_context>
chip_gen: v6e
topology: v6e:2x2x1
jax: 0.10.0
libtpu: 0.0.40
codegen_flags: <defaults>
</compile_context>

<pallas_src>
import functools

import jax
import jax.numpy as jnp
from jax import lax
from jax.experimental import pallas as pl
from jax.experimental.pallas import tpu as pltpu


_LANE = 128
_SUBLANE = 8
_TM_CANDIDATES = (512, 256, 128, 64, 32, 16, 8)
_TN_CANDIDATES = (512, 256, 128)
_VMEM_LIMIT_BYTES = 32 * 1024 * 1024
_PALLAS_MIN_MACS = 128 * 128 * 128  # below this, fused XLA beats kernel launch cost


def _round_up(x, m):
    return ((x + m - 1) // m) * m


def _is_v5e():
    try:
        kind = jax.devices()[0].device_kind.lower()
        return ("v5 lite" in kind) or ("v5e" in kind) or ("v5litepod" in kind)
    except Exception:
        return False


def _mxu_width():
    # v5e MXUs are 128 wide; v6e/v7x are 256 wide.  Used to round the output
    # feature dim so MXU columns are not half idle on v6e/v7x while keeping
    # padded-column HBM writeback minimal on v5e.
    return 128 if _is_v5e() else 256


def _pick_tm(batch):
    """Largest M tile whose batch-padding waste is small (review item)."""
    thresh = max(batch // 8, 7)
    for tm in _TM_CANDIDATES:
        if _round_up(batch, tm) - batch <= thresh:
            return tm
    return _SUBLANE


def _pick_tn(d_pad):
    for tn in _TN_CANDIDATES:
        if d_pad % tn == 0:
            return tn
    return _LANE


def _balance_tiles(batch, d_pad, tm, tn):
    """Keep the (parallel, parallel) grid >= 2 tiles and even when cheap so
    v7x's two TensorCores stay balanced (neutral on single-TC v5e/v6e)."""
    while True:
        b_pad = _round_up(batch, tm)
        tiles = (b_pad // tm) * (d_pad // tn)
        if tiles >= 2 and (tiles % 2 == 0 or tiles >= 8):
            break
        if tn > _LANE:
            tn //= 2
        elif tm > _SUBLANE:
            tm //= 2
        else:
            break
    return tm, tn


# ----------------------------------------------------------------------------
# Pallas kernel: one long-K MXU matmul per (M, N) output tile, bias + cast once
# ----------------------------------------------------------------------------
def _make_affine_kernel(compute_dtype):
    cdt = jnp.dtype(compute_dtype)

    def kernel(x_ref, w_ref, b_ref, o_ref):
        x = x_ref[...]
        if x.dtype != cdt:
            # dtype cast fused into the kernel (no wrapper-side HBM pass).
            x = x.astype(cdt)
        # K-reduction stays entirely inside the MXU (f32 accumulation);
        # default matmul precision (see demo tolerance note).
        acc = jnp.dot(x, w_ref[...], preferred_element_type=jnp.float32)
        # Bias folded in once per output tile, single cast at store.
        o_ref[...] = (acc + b_ref[...]).astype(o_ref.dtype)

    return kernel


@functools.lru_cache(maxsize=None)
def _build_forward(n_terms, d_in, d_out, batch, b_pad, k_pad, d_pad, tm, tn,
                   in_dtype, compute_dtype, out_dtype):
    """Build (and cache) a jitted concat+pad+pallas_call+slice for one config."""
    in_dt = jnp.dtype(in_dtype)
    w_dt = jnp.dtype(compute_dtype)
    out_dt = jnp.dtype(out_dtype)
    grid = (b_pad // tm, d_pad // tn)

    # Free scheduling hint for XLA around the custom call.
    cost = pl.CostEstimate(
        flops=2 * b_pad * k_pad * d_pad,
        transcendentals=0,
        bytes_accessed=(b_pad * k_pad * in_dt.itemsize          # activations
                        + grid[0] * k_pad * d_pad * w_dt.itemsize  # W re-fetch per i
                        + d_pad * 4                               # bias
                        + b_pad * d_pad * out_dt.itemsize))       # output

    call = pl.pallas_call(
        _make_affine_kernel(compute_dtype),
        out_shape=jax.ShapeDtypeStruct((b_pad, d_pad), out_dt),
        grid_spec=pltpu.PrefetchScalarGridSpec(
            num_scalar_prefetch=0,
            grid=grid,
            in_specs=[
                # Activations in native dtype (cast happens in-kernel).
                pl.BlockSpec((tm, k_pad), lambda i, j: (i, 0)),
                # Row-stacked, padded weight slab; re-fetched per i wrap only.
                pl.BlockSpec((k_pad, tn), lambda i, j: (0, j)),
                pl.BlockSpec((1, tn), lambda i, j: (0, j)),
            ],
            out_specs=pl.BlockSpec((tm, tn), lambda i, j: (i, j)),
        ),
        compiler_params=pltpu.CompilerParams(
            # Independent output tiles -> megacore / dual-TC sharding on v7x.
            dimension_semantics=("parallel", "parallel"),
            vmem_limit_bytes=_VMEM_LIMIT_BYTES,
        ),
        cost_estimate=cost,
    )

    def fwd(x_terms, w_pad, bias_pad):
        # Single fused concat + pad pass over the activations (under this jit);
        # no astype here — the compute-dtype cast happens inside the kernel.
        x = x_terms[0] if n_terms == 1 else jnp.concatenate(x_terms, axis=-1)
        x = jnp.pad(x, ((0, b_pad - batch), (0, k_pad - d_in)))
        y = call(x, w_pad, bias_pad)
        return y[:batch, :d_out]

    return jax.jit(fwd)


# ----------------------------------------------------------------------------
# JAX port of the `Function` module
# ----------------------------------------------------------------------------
class Function:
    """Homeokinesis Function: state_dict -> state_dict affine map (Pallas)."""

    def __init__(self, compute_dtype=jnp.float32, backend="auto", **kwargs):
        self.func_name = kwargs["func_name"]
        self.inputs = kwargs["inputs"]
        self.outputs = kwargs["outputs"]
        self.state_spec = kwargs["state_spec"]
        self.input_specs = {t: self.state_spec[t] for t in self.inputs}
        self.output_specs = {t: self.state_spec[t] for t in self.outputs}

        self.compute_dtype = jnp.dtype(compute_dtype)  # jnp.bfloat16 for big specs
        self.backend = backend                         # "auto" | "pallas" | "xla"

        d_in = int(sum(self.input_specs.values()))
        d_out = int(sum(self.output_specs.values()))
        self._d_in, self._d_out = d_in, d_out

        # K padded to a full lane multiple -> unmasked vector loads + clean MXU
        # cadence; output dim padded to the MXU width (256 on v6e/v7x, 128 on
        # v5e) -> full-width MXU pushes, lane-dense unmasked stores.
        self._k_pad = _round_up(max(d_in, 1), _LANE)
        self._d_pad = _round_up(max(d_out, 1), _mxu_width())

        # Deterministic synthetic parameters (no checkpoint load):
        # one affine map from concat(inputs) -> concat(outputs).
        key = jax.random.PRNGKey(42)
        k_w, k_b = jax.random.split(key)
        scale = 1.0 / jnp.sqrt(jnp.float32(max(d_in, 1)))
        self.weight = jax.random.normal(k_w, (d_in, d_out), jnp.float32) * scale
        self.bias = jax.random.normal(k_b, (1, d_out), jnp.float32) * 0.01

        # Row-stacked + zero-padded (k_pad, d_pad) weight built ONCE here so the
        # kernel performs exactly one long-K matmul per output tile (no per-term
        # tiny-K dots, no full-tile f32 VPU accumulate passes).
        self._w_pad = jnp.pad(
            self.weight,
            ((0, self._k_pad - d_in), (0, self._d_pad - d_out)),
        ).astype(self.compute_dtype)
        self._bias_pad = jnp.pad(
            self.bias, ((0, 0), (0, self._d_pad - d_out))).astype(jnp.float32)

    # -- Pallas hot path -----------------------------------------------------
    def _forward_pallas(self, x_terms, batch, out_dtype):
        tm = _pick_tm(batch)
        tn = _pick_tn(self._d_pad)
        tm, tn = _balance_tiles(batch, self._d_pad, tm, tn)
        b_pad = _round_up(batch, tm)

        fwd = _build_forward(
            len(x_terms), self._d_in, self._d_out, batch,
            b_pad, self._k_pad, self._d_pad, tm, tn,
            jnp.dtype(x_terms[0].dtype).name,
            self.compute_dtype.name,
            jnp.dtype(out_dtype).name,
        )
        return fwd(x_terms, self._w_pad, self._bias_pad)

    # -- forward ---------------------------------------------------------------
    def forward(self, state_dict):
        x_terms = [state_dict[t] for t in self.inputs]

        # Consistency checks: all terms 2-D, shared batch dim, spec'd features.
        batch = int(x_terms[0].shape[0])
        for t, x in zip(self.inputs, x_terms):
            if x.ndim != 2 or int(x.shape[0]) != batch:
                raise ValueError(
                    f"input term {t!r} has shape {x.shape}; expected "
                    f"({batch}, {self.input_specs[t]})")
            if int(x.shape[1]) != int(self.input_specs[t]):
                raise ValueError(
                    f"input term {t!r} feature dim {x.shape[1]} != spec "
                    f"{self.input_specs[t]}")
        out_dtype = x_terms[0].dtype

        use_pallas = (self.backend == "pallas") or (
            self.backend == "auto"
            and batch * self._d_in * self._d_out >= _PALLAS_MIN_MACS
        )

        if use_pallas:
            y = self._forward_pallas(x_terms, batch, out_dtype)
        else:
            # Tiny problems: pallas_call fixed overhead dominates -> fused XLA.
            x = jnp.concatenate(x_terms, axis=-1).astype(self.compute_dtype)
            y = (jnp.dot(x, self.weight.astype(self.compute_dtype),
                         preferred_element_type=jnp.float32)
                 + self.bias).astype(out_dtype)

        # Split result back into named output terms (padded cols already dropped).
        out = dict(state_dict)
        off = 0
        for t in self.outputs:
            d = self.output_specs[t]
            out[t] = y[:, off:off + d]
            off += d
        return out

    __call__ = forward


# ----------------------------------------------------------------------------
# Demo / self-test
# ----------------------------------------------------------------------------
if __name__ == "__main__":
    # NOTE: in-kernel dot uses default TPU matmul precision while the reference
    # below uses HIGHEST; the 1e-3 tolerance covers the difference at these K.

    # --- toy shape from the spec (Pallas path forced; "auto" would route this
    #     tiny problem to fused XLA) ------------------------------------------
    B = 8
    state_spec = {"x": 16, "y": 8, "xi": 16}
    fn = Function(func_name="model", inputs=["x", "y"], outputs=["xi"],
                  state_spec=state_spec, backend="pallas")

    key = jax.random.PRNGKey(0)
    kx, ky = jax.random.split(key)
    state = {
        "x": jax.random.normal(kx, (B, state_spec["x"]), jnp.float32),
        "y": jax.random.normal(ky, (B, state_spec["y"]), jnp.float32),
    }
    new_state = fn(state)
    xi = jax.block_until_ready(new_state["xi"])

    x_cat = jnp.concatenate([state["x"], state["y"]], axis=-1)
    ref = jnp.dot(x_cat, fn.weight, precision=lax.Precision.HIGHEST) + fn.bias
    assert xi.shape == (B, state_spec["xi"])
    assert jnp.allclose(xi, ref, atol=1e-3, rtol=1e-3)

    # --- larger multi-term / multi-output case: exercises the single long-K
    #     matmul, N tiling / TC balancing, and output splitting ----------------
    B2 = 256
    spec2 = {"s": 160, "m": 96, "xi": 256, "eta": 64}
    fn2 = Function(func_name="controller", inputs=["s", "m"],
                   outputs=["xi", "eta"], state_spec=spec2, backend="pallas")
    k1, k2 = jax.random.split(jax.random.PRNGKey(1))
    state2 = {
        "s": jax.random.normal(k1, (B2, spec2["s"]), jnp.float32),
        "m": jax.random.normal(k2, (B2, spec2["m"]), jnp.float32),
    }
    out2 = fn2(state2)
    y2 = jax.block_until_ready(
        jnp.concatenate([out2["xi"], out2["eta"]], axis=-1))
    x2 = jnp.concatenate([state2["s"], state2["m"]], axis=-1)
    ref2 = jnp.dot(x2, fn2.weight, precision=lax.Precision.HIGHEST) + fn2.bias
    assert y2.shape == (B2, spec2["xi"] + spec2["eta"])
    assert jnp.allclose(y2, ref2, atol=1e-3, rtol=1e-3)

    # --- awkward batch size: exercises tm selection / batch-padding logic -----
    B3 = 44
    out3 = fn2({"s": state2["s"][:B3], "m": state2["m"][:B3]})
    y3 = jax.block_until_ready(
        jnp.concatenate([out3["xi"], out3["eta"]], axis=-1))
    assert y3.shape == (B3, spec2["xi"] + spec2["eta"])
    assert jnp.allclose(y3, ref2[:B3], atol=1e-3, rtol=1e-3)

    print("KERNEL_OK")
</pallas_src>

<mosaic_0001>
module attributes {stable_mosaic.version = 11 : i64} {
  func.func @kernel(%arg0: i32, %arg1: i32, %arg2: memref<8x128xf32, #tpu.memory_space<vmem>>, %arg3: memref<128x128xf32, #tpu.memory_space<vmem>>, %arg4: memref<1x128xf32, #tpu.memory_space<vmem>>, %arg5: memref<8x128xf32, #tpu.memory_space<vmem>>) attributes {dimension_semantics = [#tpu.dimension_semantics<parallel>, #tpu.dimension_semantics<parallel>], iteration_bounds = array<i64: 1, 2>, scalar_prefetch = 0 : i64, scratch_operands = 0 : i64, tpu.core_type = #tpu.core_type<tc>, window_params = [{transform_indices = @transform_0, window_bounds = array<i64: 8, 128>}, {transform_indices = @transform_1, window_bounds = array<i64: 128, 128>}, {transform_indices = @transform_2, window_bounds = array<i64: 1, 128>}, {transform_indices = @transform_3, window_bounds = array<i64: 8, 128>}]} {
    %c0 = arith.constant 0 : index
    %c0_0 = arith.constant 0 : index
    %0 = vector.load %arg2[%c0, %c0_0] : memref<8x128xf32, #tpu.memory_space<vmem>>, vector<8x128xf32>
    %c0_1 = arith.constant 0 : index
    %c0_2 = arith.constant 0 : index
    %1 = vector.load %arg3[%c0_1, %c0_2] : memref<128x128xf32, #tpu.memory_space<vmem>>, vector<128x128xf32>
    %cst = arith.constant dense<0.000000e+00> : vector<8x128xf32>
    %2 = tpu.matmul %0, %1, %cst {dimension_numbers = #tpu.dot_dimension_numbers<[1], [0], [0], [1], [0, 0, 1, 1], [], []>} : vector<8x128xf32>, vector<128x128xf32>, vector<8x128xf32> -> vector<8x128xf32>
    %c0_3 = arith.constant 0 : index
    %c0_4 = arith.constant 0 : index
    %3 = vector.load %arg4[%c0_3, %c0_4] : memref<1x128xf32, #tpu.memory_space<vmem>>, vector<1x128xf32>
    %4 = vector.broadcast %3 : vector<1x128xf32> to vector<8x128xf32>
    %5 = arith.addf %2, %4 : vector<8x128xf32>
    %c0_5 = arith.constant 0 : index
    %c0_6 = arith.constant 0 : index
    %6 = vector.load %arg5[%c0_5, %c0_6] : memref<8x128xf32, #tpu.memory_space<vmem>>, vector<8x128xf32>
    tpu.vector_store %arg5[%c0_5, %c0_6], %5 {strides = array<i32>} : memref<8x128xf32, #tpu.memory_space<vmem>>, vector<8x128xf32>,
    return
  }
  func.func @transform_0(%arg0: i32, %arg1: i32) -> (i32, i32) {
    %c0_i32 = arith.constant 0 : i32
    %c0_i32_0 = arith.constant 0 : i32
    return %arg0, %c0_i32 : i32, i32
  }
  func.func @transform_1(%arg0: i32, %arg1: i32) -> (i32, i32) {
    %c0_i32 = arith.constant 0 : i32
    %c0_i32_0 = arith.constant 0 : i32
    return %c0_i32, %arg1 : i32, i32
  }
  func.func @transform_2(%arg0: i32, %arg1: i32) -> (i32, i32) {
    %c0_i32 = arith.constant 0 : i32
    %c0_i32_0 = arith.constant 0 : i32
    return %c0_i32, %arg1 : i32, i32
  }
  func.func @transform_3(%arg0: i32, %arg1: i32) -> (i32, i32) {
    %c0_i32 = arith.constant 0 : i32
    return %arg0, %arg1 : i32, i32
  }
}

</mosaic_0001>

<bundles_post_ra>
// kernel: fwd.1
= control target key start
LH: loop header
LB: loop body
LE: loop exit
PB: predicated region body
PF: predicated region fallthrough
CT: control target
= control target key end

     0   :  { %8 = vsyncpa [#allocation3], 0  ;;  %s802_s0 = inlined_call_operand.vmem [shape: f32[8,128], index: 0, kind: input, shape index: {}]   ;;  %s803_s1 = inlined_call_operand.hbm [shape: f32[128,256], index: 1, kind: input, shape index: {}]   ;;  %s804_s2 = inlined_call_operand.vmem [shape: f32[1,256], index: 2, kind: input, shape index: {}]   ;;  %s805_s3 = inlined_call_operand.vmem [shape: f32[8,256], index: 3, kind: output, shape index: {}]  }
   0x1   :  { %10 = vsyncpa [#allocation3 + $0x1], 0  ;;  %s680_s12 = smov 0   ;;  %s682_s13 = smov 0  }
   0x2   :  { %s684_s14 = smov 0   ;;  %s686_s15 = smov 0  }
   0x3   :  { %s688_s16 = smov 0   ;;  %s690_s17 = smov 0  }
   0x4 LB: > { %s449_s18 = sadd.s32 4294967295, %s652_s17   ;;  %s25_s19 = sadd.s32 1, %s648_s16  ;;  %s652_s17 = sphi %s690_s17, %s16_s17   ;;  %s648_s16 = sphi %s688_s16, %s813_s16   ;;  %s644_s15 = sphi %s686_s15, %s812_s15   ;;  %s640_s14 = sphi %s684_s14, %s811_s14   ;;  %s636_s13 = sphi %s682_s13, %s810_s13   ;;  %s632_s12 = sphi %s680_s12, %s809_s12  }
   0x5   : > { %p26_p0 = scmp.ge.s32.totalorder %s25_s19, 2  ;;  %s61_s20 = sadd.s32 1, %s640_s14 }
   0x6   : > { %p68_p1 = scmp.ne.s32.totalorder %s640_s14, %s636_s13  ;;  %p69_p2 = scmp.eq.s32.totalorder %s652_s17, 0 }
   0x7   : > { %s815_s19 = smov (%p26_p0, %s25_s19), 0  ;;  %p74_p4 = scmp.ne.s32.totalorder %s636_s13, %s632_s12 }
   0x8   : > { %p716_p3 = por %p69_p2, %p68_p1  ;;  %s58_s22 = ssub.s32 %s648_s16, %s815_s19 }
   0x9   : > { %p75_p5 = scmp.eq.s32.totalorder %s449_s18, 0  ;;  %p59_p6 = scmp.eq.s32.totalorder %s58_s22, 0 }
   0xa   : > { %p520_p8 = scmp.lt.s32.totalorder %s652_s17, 2  ;;  %s159_s25 = sand.u32 1, %s640_s14  }
   0xb   : > { %p723_p7 = por %p75_p5, %p74_p4  ;;  %s455_s26 = sshll.u32 %s648_s16, 7 }
   0xc   : > { %s729_s24 = scalar_select %p59_p6, %s640_s14, %s61_s20  }
   0xd   : > { %s454_s27 = sshll.u32 %s159_s25, 7  ;;  %s168_s30 = scalar_lea.hbm %s803_s1, %s455_s26 }
   0xe   : > { %s163_s4 = scalar_lea.vmem [#allocation2], %s454_s27  ;;  %p738_p9 = pnand %p520_p8, %p716_p3 }
   0xf   : > { %s169_s5 = sshll.u32 %s163_s4, 4  ;;  %p456_p10 = scmp.ge.s32.totalorder %s652_s17, 1  ;;  %s170_s5 = int_to_ptr.vmem [resolvable:$true] %s169_s5 }
  0x10   : > { %s160_s7 = scalar_lea.sflag [#allocation3], %s159_s25  ;;  %p576_p11 = pneg %p738_p9 }
  0x11   : > { %s587_s8 = scalar_lea.vmem %s170_s5, 2048  ;;  %s654_s9 = smov [#allocation2]  }
  0x12   : > { %p588_p12 = scmp.ne.s32.totalorder %s170_s5, %s587_s8  ;;  %s592_s10 = sshll.u32 %s654_s9, 4  ;;  %s593_s10 = int_to_ptr.vmem [resolvable:$false] %s592_s10 }
  0x13   : > { %s594_s11 = scalar_lea.vmem %s593_s10, 4096  ;;  %p595_p1 = scmp.lt.s32.totalorder %s170_s5, %s593_s10 }
  0x14   : > { %p590_p13 = pnand %p588_p12, %p576_p11  ;;  %p596_p2 = scmp.lt.s32.totalorder %s594_s11, %s587_s8 }
  0x16   : > { %p591_p0 = pneg %p590_p13  ;;  %p597_p3 = por %p596_p2, %p595_p1 }
  0x18   : > { %p598_p4 = pnand %p597_p3, %p591_p0 }
  0x1a   : > { %601 = shalt.err (!%p598_p4)
}
  0x1b   : > { %s655_s12 = smov 256   ;;  %s656_s18 = smov 128  }
  0x1c   : > { %s657_s20 = smov 8   ;;  %p183_p5 = scmp.lt.s32.totalorder %s652_s17, 3 }
  0x1d   : > { %519 = dma.hbm_to_vmem [thread:$0]  (!%p738_p9), %s168_s30, 2048, %s170_s5, %s160_s7, %s655_s12, %s656_s18, %s657_s20  }
  0x1e   : > { %p184_p6 = pnand %p456_p10, %p183_p5 }
  0x1f   : > { %s189_s21 = sand.u32 (!%p184_p6), 1, %s636_s13  }
  0x20   : > { %187 = sbr.rel (%p184_p6) target bundleno = 267 (0x10b), region = 32  ;;  %s457_s22 = sshll.u32 (!%p184_p6), %s189_s21, 7 }
  0x21   : > { %s190_s25 = scalar_lea.sflag (!%p184_p6), [#allocation3], %s189_s21  ;;  %s751_s26 = scalar_lea.vmem (!%p184_p6), [#allocation2], %s457_s22 }
  0x25   : > { %627 = dma.done.wait (%p723_p7), %s190_s25, 2048  }
  0x26   : > { %629 = vsyncadd (%p723_p7), %s190_s25, 4294965248  ;;  %v658_v0 = vmov 0.0   ;;  %vm659_vm0 = vmmov 0   ;;  %v257_v1 = vld [vmem:[%s751_s26 + $0x78] sm:$0xff]  ;;  %v256_v2 = vld [vmem:[%s751_s26 + $0x70] sm:$0xff]  ;;  %p230_p7 = scmp.lt.s32.totalorder %s644_s15, 1 }
  0x27   : > { %479 = vmatprep.subr.mxu0 %v658_v0  ;;  %511 = vmatprep.mubr.msk.f32.mxu0 %vm659_vm0, %v658_v0  ;;  %v255_v3 = vld [vmem:[%s751_s26 + $0x68] sm:$0xff]  ;;  %v254_v4 = vld [vmem:[%s751_s26 + $0x60] sm:$0xff]  ;;  %v253_v5 = vld [vmem:[%s751_s26 + $0x58] sm:$0xff] }
  0x28   : > { %480 = vmatpush3.msra.mxu0 %v257_v1  ;;  %v252_v6 = vld [vmem:[%s751_s26 + $0x50] sm:$0xff]  ;;  %v251_v7 = vld [vmem:[%s751_s26 + $0x48] sm:$0xff]  ;;  %v250_v8 = vld [vmem:[%s751_s26 + $0x40] sm:$0xff]  ;;  %s817_s15 = smov (!%p230_p7, %s644_s15), 1 }
  0x29   : > { %481 = vmatprep.subr.mxu0 %v658_v0  ;;  %v249_v9 = vld [vmem:[%s751_s26 + $0x38] sm:$0xff]  ;;  %v248_v10 = vld [vmem:[%s751_s26 + $0x30] sm:$0xff]  ;;  %v247_v11 = vld [vmem:[%s751_s26 + $0x28] sm:$0xff]  ;;  %s232_s30 = scalar_lea.vmem %s804_s2, %s817_s15  ;;  %s458_s4 = sshll.u32 %s817_s15, 3 }
  0x2a   : > { %482 = vmatpush3.msra.mxu0 %v256_v2  ;;  %v246_v12 = vld [vmem:[%s751_s26 + $0x20] sm:$0xff]  ;;  %v245_v13 = vld [vmem:[%s751_s26 + $0x18] sm:$0xff]  ;;  %v244_v14 = vld [vmem:[%s751_s26 + $0x10] sm:$0xff]  ;;  %s240_s7 = scalar_lea.vmem %s805_s3, %s458_s4 }
  0x2b   : > { %483 = vmatprep.subr.mxu0 %v658_v0  ;;  %v243_v15 = vld [vmem:[%s751_s26 + $0x8] sm:$0xff]  ;;  %v242_v16 = vld [vmem:[%s751_s26] sm:$0xff] }
  0x2c   : > { %484 = vmatpush3.msra.mxu0 %v255_v3  ;;  %v241_v17 = vld [vmem:[%s802_s0] sm:$0xff] }
  0x2d   : > { %485 = vmatprep.subr.mxu0 %v658_v0  ;;  %v459_v18 = vld [vmem:[%s232_s30] ss:$0 sm:$0xff] }
  0x2e   : > { %486 = vmatpush3.msra.mxu0 %v254_v4 }
  0x2f   : > { %487 = vmatprep.subr.mxu0 %v658_v0 }
  0x30   : > { %488 = vmatpush3.msra.mxu0 %v253_v5 }
  0x31   : > { %489 = vmatprep.subr.mxu0 %v658_v0 }
  0x32   : > { %490 = vmatpush3.msra.mxu0 %v252_v6 }
  0x33   : > { %491 = vmatprep.subr.mxu0 %v658_v0 }
  0x34   : > { %492 = vmatpush3.msra.mxu0 %v251_v7 }
  0x35   : > { %493 = vmatprep.subr.mxu0 %v658_v0 }
  0x36   : > { %494 = vmatpush3.msra.mxu0 %v250_v8 }
  0x37   : > { %495 = vmatprep.subr.mxu0 %v658_v0 }
  0x38   : > { %496 = vmatpush3.msra.mxu0 %v249_v9 }
  0x39   : > { %497 = vmatprep.subr.mxu0 %v658_v0 }
  0x3a   : > { %498 = vmatpush3.msra.mxu0 %v248_v10 }
  0x3b   : > { %499 = vmatprep.subr.mxu0 %v658_v0 }
  0x3c   : > { %500 = vmatpush3.msra.mxu0 %v247_v11 }
  0x3d   : > { %501 = vmatprep.subr.mxu0 %v658_v0 }
  0x3e   : > { %502 = vmatpush3.msra.mxu0 %v246_v12 }
  0x3f   : > { %503 = vmatprep.subr.mxu0 %v658_v0 }
  0x40   : > { %504 = vmatpush3.msra.mxu0 %v245_v13 }
  0x41   : > { %505 = vmatprep.subr.mxu0 %v658_v0 }
  0x42   : > { %506 = vmatpush3.msra.mxu0 %v244_v14 }
  0x43   : > { %507 = vmatprep.subr.mxu0 %v658_v0 }
  0x44   : > { %508 = vmatpush3.msra.mxu0 %v243_v15 }
  0x45   : > { %509 = vmatprep.subr.mxu0 %v658_v0 }
  0x46   : > { %510 = vmatpush3.msra.mxu0 %v242_v16 }
  0x47   : > { %512 = vmatmul.mubr.f32.vlgmr.msra.gmra.mxu0 %v241_v17 }
 0x107   : > { %v331_v19 = vpop.f32.mrf.mxu0 }
 0x108   : > { %v332_v20 = vadd.f32 %v459_v18, %v331_v19 }
 0x109   : > { %v513_v21 = vpop.f32.mrf.mxu0 }
 0x10a   : > { %335 = vst [vmem:[%s240_s7] sm:$0xff] %v332_v20 }
 0x10b PF: > { %s16_s17 = sadd.s32 1, %s652_s17   ;;  %s809_s12 = smov %s636_s13 }
 0x10c   : > { %p13_p8 = scmp.ge.s32.totalorder %s16_s17, 4   ;;  %s810_s13 = smov %s640_s14 }
 0x10d   : > { %s811_s14 = smov %s729_s24  ;;  %s812_s15 = smov %s648_s16 }
 0x10e   : > { %s813_s16 = smov %s815_s19  ;;  %15 = sbr.rel (!%p13_p8) target bundleno = 4 (0x4), region = 78 }
 0x113   :  { %363 = vsyncpa [#allocation3], 1 }
 0x114   :  { %365 = vsyncpa [#allocation3 + $0x1], 1 }

</bundles_post_ra>
